<compile_context>
chip_gen: v6e
topology: v6e:2x2x1
jax: 0.10.0
libtpu: 0.0.40
codegen_flags: <defaults>
</compile_context>

<pallas_src>
import jax
import jax.numpy as jnp
from jax.experimental import pallas as pl
from jax.experimental.pallas import tpu as pltpu


def _cdiv(a, b):
    return -(-a // b)


def _round_up(a, b):
    return _cdiv(a, b) * b


def _fused_double_layer_kernel(x_ref, w1_ref, b1_ref, w2_ref, b2_ref, out_ref):
    """Both 2-layer heads as two lane-dense MXU matmuls with f32 accumulation.

    x_ref:   (TILE_B, F)         activations (f32 or bf16)
    w1_ref:  (F, H),   H = 2F    concat(w1_pi, w1_vf)
    b1_ref:  (1, H)              concat(b1_pi, b1_vf)
    w2_ref:  (H, O),   O = dp+dv block-diag(w2_pi, w2_vf)
    b2_ref:  (1, O)              concat(b2_pi, b2_vf)
    out_ref: (TILE_B, O) f32     lanes [0,dp) = policy, [dp,dp+dv) = value
    """
    x = x_ref[...]
    h = jnp.dot(x, w1_ref[...], preferred_element_type=jnp.float32)
    h = jnp.maximum(h + b1_ref[...].astype(jnp.float32), 0.0)
    h = h.astype(w2_ref.dtype)               # bf16 path: feed MXU-native dtype
    o = jnp.dot(h, w2_ref[...], preferred_element_type=jnp.float32)
    o = jnp.maximum(o + b2_ref[...].astype(jnp.float32), 0.0)
    out_ref[...] = o.astype(out_ref.dtype)


def double_layer_network(x, w1, b1, w2, b2, *, layer_dim_pi, layer_dim_vf,
                         tile_b=2048, min_tiles=4, no_grid_max_rows=512):
    """Fused policy/value heads. Returns (pi, vf) as float32."""
    B, F = x.shape
    H = w1.shape[1]
    O = w2.shape[1]
    assert w1.shape[0] == F and w2.shape[0] == H
    assert O == layer_dim_pi + layer_dim_vf

    compute_dtype = w1.dtype
    x = x.astype(compute_dtype)
    itemsize = jnp.dtype(compute_dtype).itemsize

    Bp8 = _round_up(B, 8)                    # sublane alignment

    def _cost(rows):
        flops = 2 * rows * F * H + 2 * rows * H * O
        bytes_accessed = (itemsize * (rows * F + w1.size + b1.size + w2.size + b2.size)
                          + 4 * rows * O)
        return pl.CostEstimate(flops=flops, transcendentals=0,
                               bytes_accessed=bytes_accessed)

    if Bp8 <= max(no_grid_max_rows, 8):
        # Latency path: single whole-array block, no grid / pipeline machinery.
        if Bp8 != B:
            x = jnp.pad(x, ((0, Bp8 - B), (0, 0)))
        out = pl.pallas_call(
            _fused_double_layer_kernel,
            out_shape=jax.ShapeDtypeStruct((Bp8, O), jnp.float32),
            cost_estimate=_cost(Bp8),
        )(x, w1, b1, w2, b2)
    else:
        # Throughput path: tile over batch. Fat tiles amortize the ~0.35 us
        # per-step pipeline overhead, but keep n_tiles >= min_tiles so v7x's
        # two TensorCores both get work and each still pipelines >= 2 steps.
        tb = max(8, min(tile_b, _round_up(_cdiv(Bp8, min_tiles), 8)))
        n_tiles = _cdiv(Bp8, tb)
        Bp = n_tiles * tb
        if Bp != B:
            x = jnp.pad(x, ((0, Bp - B), (0, 0)))
        out = pl.pallas_call(
            _fused_double_layer_kernel,
            out_shape=jax.ShapeDtypeStruct((Bp, O), jnp.float32),
            grid=(n_tiles,),
            in_specs=[
                # Streaming activations. If an xprof trace ever shows exposed
                # x-DMA, add pipeline_mode=pl.Buffered(3) here.
                pl.BlockSpec((tb, F), lambda i: (i, 0)),
                # Fused params: full-array blocks, DMA'd once, resident.
                pl.BlockSpec(w1.shape, lambda i: (0, 0)),
                pl.BlockSpec(b1.shape, lambda i: (0, 0)),
                pl.BlockSpec(w2.shape, lambda i: (0, 0)),
                pl.BlockSpec(b2.shape, lambda i: (0, 0)),
            ],
            out_specs=pl.BlockSpec((tb, O), lambda i: (i, 0)),
            compiler_params=pltpu.CompilerParams(
                dimension_semantics=("parallel",)),
            cost_estimate=_cost(Bp),
        )(x, w1, b1, w2, b2)

    pi = out[:B, :layer_dim_pi]
    vf = out[:B, layer_dim_pi:layer_dim_pi + layer_dim_vf]
    return pi, vf


def init_params(key, feature_dim=64, layer_dim_pi=64, layer_dim_vf=64):
    """PyTorch-default-style init (uniform +/- 1/sqrt(fan_in)), weights (in, out)."""
    keys = jax.random.split(key, 8)
    bound = 1.0 / jnp.sqrt(feature_dim)

    def uni(k, shape):
        return jax.random.uniform(k, shape, jnp.float32, -bound, bound)

    return {
        "w1p": uni(keys[0], (feature_dim, feature_dim)),
        "b1p": uni(keys[1], (1, feature_dim)),
        "w2p": uni(keys[2], (feature_dim, layer_dim_pi)),
        "b2p": uni(keys[3], (1, layer_dim_pi)),
        "w1v": uni(keys[4], (feature_dim, feature_dim)),
        "b1v": uni(keys[5], (1, feature_dim)),
        "w2v": uni(keys[6], (feature_dim, layer_dim_vf)),
        "b2v": uni(keys[7], (1, layer_dim_vf)),
    }


def pack_params(p, dtype=jnp.float32):
    """Fuse both heads into four (8,128)-aligned tensors.

    w1 = concat(w1p, w1v) along outputs; w2 = block-diag(w2p, w2v). The zero
    blocks contribute exactly 0, so results equal the per-head matmuls.
    """
    F = p["w1p"].shape[0]
    dp = p["w2p"].shape[1]
    dv = p["w2v"].shape[1]
    w1 = jnp.concatenate([p["w1p"], p["w1v"]], axis=1)                 # (F, 2F)
    b1 = jnp.concatenate([p["b1p"], p["b1v"]], axis=1)                 # (1, 2F)
    w2 = jnp.zeros((2 * F, dp + dv), jnp.float32)
    w2 = w2.at[:F, :dp].set(p["w2p"]).at[F:, dp:].set(p["w2v"])        # (2F, dp+dv)
    b2 = jnp.concatenate([p["b2p"], p["b2v"]], axis=1)                 # (1, dp+dv)
    return tuple(t.astype(dtype) for t in (w1, b1, w2, b2))


def reference_forward(x, p, compute_dtype=jnp.float32):
    """Pure-JAX reference of DoubleLayerNetwork.forward.

    compute_dtype=f32 is the exact original module math; bf16 mirrors the
    kernel's bf16-input / f32-accumulate path.
    """
    def head(w1, b1, w2, b2):
        xd = x.astype(compute_dtype)
        h = jnp.dot(xd, w1.astype(compute_dtype), preferred_element_type=jnp.float32)
        h = jnp.maximum(h + b1.astype(compute_dtype).astype(jnp.float32), 0.0)
        h = h.astype(compute_dtype)
        o = jnp.dot(h, w2.astype(compute_dtype), preferred_element_type=jnp.float32)
        o = jnp.maximum(o + b2.astype(compute_dtype).astype(jnp.float32), 0.0)
        return o

    pi = head(p["w1p"], p["b1p"], p["w2p"], p["b2p"])
    vf = head(p["w1v"], p["b1v"], p["w2v"], p["b2v"])
    return pi, vf


if __name__ == "__main__":
    key = jax.random.PRNGKey(0)
    k_x1, k_x2, k_x3, k_p = jax.random.split(key, 4)

    feature_dim, layer_dim_pi, layer_dim_vf = 64, 64, 64
    params = init_params(k_p, feature_dim, layer_dim_pi, layer_dim_vf)

    # --- Test 1: tiny batch, f32, no-grid latency path (exact vs reference) ---
    x_small = jax.random.normal(k_x1, (8, feature_dim), jnp.float32)
    w1, b1, w2, b2 = pack_params(params, jnp.float32)
    pi, vf = double_layer_network(x_small, w1, b1, w2, b2,
                                  layer_dim_pi=layer_dim_pi,
                                  layer_dim_vf=layer_dim_vf)
    jax.block_until_ready((pi, vf))
    pi_ref, vf_ref = reference_forward(x_small, params)
    assert pi.shape == (8, layer_dim_pi) and vf.shape == (8, layer_dim_vf)
    assert jnp.allclose(pi, pi_ref, atol=1e-5, rtol=1e-5)
    assert jnp.allclose(vf, vf_ref, atol=1e-5, rtol=1e-5)

    # --- Test 2: larger batch, f32, tiled/pipelined grid path + batch padding --
    x_mid = jax.random.normal(k_x2, (600, feature_dim), jnp.float32)
    pi, vf = double_layer_network(x_mid, w1, b1, w2, b2,
                                  layer_dim_pi=layer_dim_pi,
                                  layer_dim_vf=layer_dim_vf)
    jax.block_until_ready((pi, vf))
    pi_ref, vf_ref = reference_forward(x_mid, params)
    assert pi.shape == (600, layer_dim_pi) and vf.shape == (600, layer_dim_vf)
    assert jnp.allclose(pi, pi_ref, atol=1e-5, rtol=1e-5)
    assert jnp.allclose(vf, vf_ref, atol=1e-5, rtol=1e-5)

    # --- Test 3: bf16 params/activations (MXU-native), f32 accumulation -------
    x_bf = jax.random.normal(k_x3, (32, feature_dim), jnp.float32)
    w1b, b1b, w2b, b2b = pack_params(params, jnp.bfloat16)
    pi, vf = double_layer_network(x_bf, w1b, b1b, w2b, b2b,
                                  layer_dim_pi=layer_dim_pi,
                                  layer_dim_vf=layer_dim_vf)
    jax.block_until_ready((pi, vf))
    pi_ref, vf_ref = reference_forward(x_bf, params, compute_dtype=jnp.bfloat16)
    assert jnp.allclose(pi, pi_ref, atol=1e-2, rtol=1e-2)
    assert jnp.allclose(vf, vf_ref, atol=1e-2, rtol=1e-2)

    print("KERNEL_OK")
</pallas_src>

<mosaic_0001>
module attributes {stable_mosaic.version = 11 : i64} {
  func.func @_fused_double_layer_kernel(%arg0: memref<8x64xf32, #tpu.memory_space<vmem>>, %arg1: memref<64x128xf32, #tpu.memory_space<vmem>>, %arg2: memref<1x128xf32, #tpu.memory_space<vmem>>, %arg3: memref<128x128xf32, #tpu.memory_space<vmem>>, %arg4: memref<1x128xf32, #tpu.memory_space<vmem>>, %arg5: memref<8x128xf32, #tpu.memory_space<vmem>>) attributes {dimension_semantics = [], scalar_prefetch = 0 : i64, scratch_operands = 0 : i64, tpu.core_type = #tpu.core_type<tc>} {
    %c0 = arith.constant 0 : index
    %c0_0 = arith.constant 0 : index
    %0 = vector.load %arg0[%c0, %c0_0] : memref<8x64xf32, #tpu.memory_space<vmem>>, vector<8x64xf32>
    %c0_1 = arith.constant 0 : index
    %c0_2 = arith.constant 0 : index
    %1 = vector.load %arg1[%c0_1, %c0_2] : memref<64x128xf32, #tpu.memory_space<vmem>>, vector<64x128xf32>
    %cst = arith.constant dense<0.000000e+00> : vector<8x128xf32>
    %2 = tpu.matmul %0, %1, %cst {dimension_numbers = #tpu.dot_dimension_numbers<[1], [0], [0], [1], [0, 0, 1, 1], [], []>} : vector<8x64xf32>, vector<64x128xf32>, vector<8x128xf32> -> vector<8x128xf32>
    %c0_3 = arith.constant 0 : index
    %c0_4 = arith.constant 0 : index
    %3 = vector.load %arg2[%c0_3, %c0_4] : memref<1x128xf32, #tpu.memory_space<vmem>>, vector<1x128xf32>
    %4 = vector.broadcast %3 : vector<1x128xf32> to vector<8x128xf32>
    %5 = arith.addf %2, %4 : vector<8x128xf32>
    %cst_5 = arith.constant 0.000000e+00 : f32
    %6 = vector.broadcast %cst_5 : f32 to vector<8x128xf32>
    %7 = arith.maximumf %5, %6 : vector<8x128xf32>
    %c0_6 = arith.constant 0 : index
    %c0_7 = arith.constant 0 : index
    %8 = vector.load %arg3[%c0_6, %c0_7] : memref<128x128xf32, #tpu.memory_space<vmem>>, vector<128x128xf32>
    %cst_8 = arith.constant dense<0.000000e+00> : vector<8x128xf32>
    %9 = tpu.matmul %7, %8, %cst_8 {dimension_numbers = #tpu.dot_dimension_numbers<[1], [0], [0], [1], [0, 0, 1, 1], [], []>} : vector<8x128xf32>, vector<128x128xf32>, vector<8x128xf32> -> vector<8x128xf32>
    %c0_9 = arith.constant 0 : index
    %c0_10 = arith.constant 0 : index
    %10 = vector.load %arg4[%c0_9, %c0_10] : memref<1x128xf32, #tpu.memory_space<vmem>>, vector<1x128xf32>
    %11 = vector.broadcast %10 : vector<1x128xf32> to vector<8x128xf32>
    %12 = arith.addf %9, %11 : vector<8x128xf32>
    %cst_11 = arith.constant 0.000000e+00 : f32
    %13 = vector.broadcast %cst_11 : f32 to vector<8x128xf32>
    %14 = arith.maximumf %12, %13 : vector<8x128xf32>
    %c0_12 = arith.constant 0 : index
    %c0_13 = arith.constant 0 : index
    %15 = vector.load %arg5[%c0_12, %c0_13] : memref<8x128xf32, #tpu.memory_space<vmem>>, vector<8x128xf32>
    tpu.vector_store %arg5[%c0_12, %c0_13], %14 {strides = array<i32>} : memref<8x128xf32, #tpu.memory_space<vmem>>, vector<8x128xf32>,
    return
  }
}

</mosaic_0001>

<bundles_post_ra>
// kernel: tpu_custom_call.1
= control target key start
LH: loop header
LB: loop body
LE: loop exit
PB: predicated region body
PF: predicated region fallthrough
CT: control target
= control target key end

     0   :  { %10 = vsyncpa [#allocation3], 0  ;;  %s521_s0 = inlined_call_operand.hbm [shape: f32[8,64], index: 0, kind: input, shape index: {}]   ;;  %s522_s1 = inlined_call_operand.hbm [shape: f32[64,128], index: 1, kind: input, shape index: {}]   ;;  %s523_s2 = inlined_call_operand.vmem [shape: f32[1,128], index: 2, kind: input, shape index: {}]   ;;  %s524_s3 = inlined_call_operand.hbm [shape: f32[128,128], index: 3, kind: input, shape index: {}]   ;;  %s525_s4 = inlined_call_operand.vmem [shape: f32[1,128], index: 4, kind: input, shape index: {}]   ;;  %s526_s5 = inlined_call_operand.hbm [shape: f32[8,128], index: 5, kind: output, shape index: {}]  }
   0x1   :  { %11 = vsyncpa [#allocation6], 0 }
   0x2   :  { %12 = vsyncpa [#allocation4], 0  ;;  %s439_s18 = smov [#allocation5]  }
   0x3   :  { %s28_s19 = sshll.u32 %s439_s18, 4  ;;  %s29_s19 = int_to_ptr.vmem [resolvable:$true] %s28_s19 }
   0x4   :  { %s361_s20 = scalar_lea.vmem %s29_s19, 1024  ;;  %p366_p1 = scmp.lt.s32.totalorder %s29_s19, %s29_s19 }
   0x5   :  { %p362_p0 = scmp.ne.s32.totalorder %s29_s19, %s361_s20  ;;  %p367_p2 = scmp.lt.s32.totalorder %s361_s20, %s361_s20 }
   0x7   :  { %p368_p3 = por %p367_p2, %p366_p1 }
   0x9   :  { %p369_p4 = pnand %p368_p3, %p362_p0 }
   0xb   :  { %372 = shalt.err (!%p369_p4)
}
   0xc   :  { %s440_s21 = smov 128   ;;  %s441_s22 = smov 8  }
   0xd   :  { %34 = dma.hbm_to_vmem [thread:$0]  %s522_s1, 1024, %s29_s19, [#allocation6], %s440_s21, %s440_s21, %s441_s22  }
   0xe   :  { %s442_s25 = smov [#allocation2]   ;;  %s443_s27 = smov [#allocation7]  }
   0xf   :  { %s19_s26 = sshll.u32 %s442_s25, 4  ;;  %s42_s28 = sshll.u32 %s443_s27, 4  ;;  %s20_s26 = int_to_ptr.vmem [resolvable:$true] %s19_s26  ;;  %s43_s28 = int_to_ptr.vmem [resolvable:$true] %s42_s28 }
  0x10   :  { %s381_s29 = scalar_lea.vmem %s20_s26, 128  ;;  %p386_p6 = scmp.lt.s32.totalorder %s20_s26, %s20_s26 }
  0x11   :  { %p382_p5 = scmp.ne.s32.totalorder %s20_s26, %s381_s29  ;;  %p387_p7 = scmp.lt.s32.totalorder %s381_s29, %s381_s29 }
  0x13   :  { %p388_p8 = por %p387_p7, %p386_p6 }
  0x15   :  { %p389_p9 = pnand %p388_p8, %p382_p5 }
  0x17   :  { %392 = shalt.err (!%p389_p9)
}
  0x18   :  { %22 = dma.hbm_to_vmem [thread:$0]  %s521_s0, 128, %s20_s26, [#allocation3]  }
  0x19   :  { %s401_s7 = scalar_lea.vmem %s43_s28, 2048  ;;  %p406_p11 = scmp.lt.s32.totalorder %s43_s28, %s43_s28 }
  0x1a   :  { %p402_p10 = scmp.ne.s32.totalorder %s43_s28, %s401_s7  ;;  %p407_p12 = scmp.lt.s32.totalorder %s401_s7, %s401_s7 }
  0x1c   :  { %p408_p13 = por %p407_p12, %p406_p11 }
  0x1e   :  { %p409_p0 = pnand %p408_p13, %p402_p10 }
  0x20   :  { %412 = shalt.err (!%p409_p0)
}
  0x21   :  { %48 = dma.hbm_to_vmem [thread:$0]  %s524_s3, 2048, %s43_s28, [#allocation6], %s440_s21, %s440_s21, %s441_s22  }
  0x22   :  { %433 = dma.done.wait [#allocation3], 128  }
  0x23   :  { %434 = vsyncadd [#allocation3], 4294967168 }
  0x24   :  { %435 = dma.done.wait [#allocation6], 3072  }
  0x25   :  { %436 = vsyncadd [#allocation6], 4294964224  ;;  %v444_v0 = vmov 0.0   ;;  %vm445_vm0 = vmmov 0   ;;  %v68_v1 = vld [vmem:[#allocation5 + $0x38] sm:$0xff]  ;;  %v67_v2 = vld [vmem:[#allocation5 + $0x30] sm:$0xff] }
  0x26   :  { %291 = vmatprep.subr.mxu0 %v444_v0  ;;  %307 = vmatprep.mubr.msk.f32.mxu0 %vm445_vm0, %v444_v0  ;;  %v66_v3 = vld [vmem:[#allocation5 + $0x28] sm:$0xff]  ;;  %v166_v4 = vld [vmem:[#allocation7 + $0x78] sm:$0xff]  ;;  %v165_v5 = vld [vmem:[#allocation7 + $0x70] sm:$0xff]  ;;  %vm76_vm1 = vcmask 523264   ;;  %s446_s11 = smov [#allocation8]  }
  0x27   :  { %310 = vmatprep.subr.mxu1 %v444_v0  ;;  %342 = vmatprep.mubr.msk.f32.mxu1 %vm445_vm0, %v444_v0  ;;  %v65_v6 = vld [vmem:[#allocation5 + $0x20] sm:$0xff]  ;;  %v164_v7 = vld [vmem:[#allocation7 + $0x68] sm:$0xff]  ;;  %v64_v8 = vld [vmem:[#allocation5 + $0x18] sm:$0xff]  ;;  %s252_s12 = sshll.u32 %s446_s11, 4  ;;  %s253_s12 = int_to_ptr.vmem [resolvable:$true] %s252_s12 }
  0x28   :  { %292 = vmatpush3.msra.mxu0 %v68_v1  ;;  %311 = vmatpush3.msra.mxu1 %v166_v4  ;;  %v163_v9 = vld [vmem:[#allocation7 + $0x60] sm:$0xff]  ;;  %v63_v10 = vld [vmem:[#allocation5 + $0x10] sm:$0xff]  ;;  %v162_v11 = vld [vmem:[#allocation7 + $0x58] sm:$0xff]  ;;  %s413_s13 = scalar_lea.vmem %s253_s12, 128  ;;  %p418_p2 = scmp.lt.s32.totalorder %s253_s12, %s253_s12 }
  0x29   :  { %293 = vmatprep.subr.mxu0 %v444_v0  ;;  %312 = vmatprep.subr.mxu1 %v444_v0  ;;  %v62_v12 = vld [vmem:[#allocation5 + $0x8] sm:$0xff]  ;;  %v161_v13 = vld [vmem:[#allocation7 + $0x50] sm:$0xff]  ;;  %v61_v14 = vld [vmem:[#allocation5] sm:$0xff]  ;;  %p414_p1 = scmp.ne.s32.totalorder %s253_s12, %s413_s13  ;;  %p419_p3 = scmp.lt.s32.totalorder %s413_s13, %s413_s13 }
  0x2a   :  { %294 = vmatpush3.msra.mxu0 %v67_v2  ;;  %313 = vmatpush3.msra.mxu1 %v165_v5  ;;  %v60_v15 = vld [vmem:[#allocation2] sm:$0xff]  ;;  %v160_v16 = vld [vmem:[#allocation7 + $0x48] sm:$0xff]  ;;  %v159_v17 = vld [vmem:[#allocation7 + $0x40] sm:$0xff] }
  0x2b   :  { %295 = vmatprep.subr.mxu0 %v444_v0  ;;  %314 = vmatprep.subr.mxu1 %v444_v0  ;;  %v158_v18 = vld [vmem:[#allocation7 + $0x38] sm:$0xff]  ;;  %v157_v19 = vld [vmem:[#allocation7 + $0x30] sm:$0xff]  ;;  %v156_v20 = vld [vmem:[#allocation7 + $0x28] sm:$0xff]  ;;  %p420_p4 = por %p419_p3, %p418_p2 }
  0x2c   :  { %296 = vmatpush3.msra.mxu0 %v66_v3  ;;  %315 = vmatpush3.msra.mxu1 %v164_v7  ;;  %v155_v21 = vld [vmem:[#allocation7 + $0x20] sm:$0xff]  ;;  %v154_v22 = vld [vmem:[#allocation7 + $0x18] sm:$0xff]  ;;  %v153_v23 = vld [vmem:[#allocation7 + $0x10] sm:$0xff] }
  0x2d   :  { %297 = vmatprep.subr.mxu0 %v444_v0  ;;  %316 = vmatprep.subr.mxu1 %v444_v0  ;;  %v152_v24 = vld [vmem:[#allocation7 + $0x8] sm:$0xff]  ;;  %v151_v25 = vld [vmem:[#allocation7] sm:$0xff]  ;;  %v262_v26 = vld [vmem:[%s523_s2] ss:$0 sm:$0xff]  ;;  %p421_p5 = pnand %p420_p4, %p414_p1 }
  0x2e   :  { %298 = vmatpush3.msra.mxu0 %v65_v6  ;;  %317 = vmatpush3.msra.mxu1 %v163_v9  ;;  %v264_v31 = vld [vmem:[%s525_s4] ss:$0 sm:$0xff] }
  0x2f   :  { %299 = vmatprep.subr.mxu0 %v444_v0  ;;  %318 = vmatprep.subr.mxu1 %v444_v0 }
  0x30   :  { %300 = vmatpush3.msra.mxu0 %v64_v8  ;;  %319 = vmatpush3.msra.mxu1 %v162_v11 }
  0x31   :  { %301 = vmatprep.subr.mxu0 %v444_v0  ;;  %320 = vmatprep.subr.mxu1 %v444_v0 }
  0x32   :  { %302 = vmatpush3.msra.mxu0 %v63_v10  ;;  %321 = vmatpush3.msra.mxu1 %v161_v13 }
  0x33   :  { %303 = vmatprep.subr.mxu0 %v444_v0  ;;  %322 = vmatprep.subr.mxu1 %v444_v0 }
  0x34   :  { %304 = vmatpush3.msra.mxu0 %v62_v12  ;;  %323 = vmatpush3.msra.mxu1 %v160_v16 }
  0x35   :  { %305 = vmatprep.subr.mxu0 %v444_v0  ;;  %324 = vmatprep.subr.mxu1 %v444_v0 }
  0x36   :  { %306 = vmatpush3.msra.mxu0 %v61_v14  ;;  %325 = vmatpush3.msra.mxu1 %v159_v17 }
  0x37   :  { %308 = vmatmul.mubr.msk.f32.vlgmr.msra.gmra.mxu0 %vm76_vm1, %v60_v15  ;;  %326 = vmatprep.subr.mxu1 %v444_v0 }
  0x38   :  { %327 = vmatpush3.msra.mxu1 %v158_v18 }
  0x39   :  { %328 = vmatprep.subr.mxu1 %v444_v0 }
  0x3a   :  { %329 = vmatpush3.msra.mxu1 %v157_v19 }
  0x3b   :  { %330 = vmatprep.subr.mxu1 %v444_v0 }
  0x3c   :  { %331 = vmatpush3.msra.mxu1 %v156_v20 }
  0x3d   :  { %332 = vmatprep.subr.mxu1 %v444_v0 }
  0x3e   :  { %333 = vmatpush3.msra.mxu1 %v155_v21 }
  0x3f   :  { %334 = vmatprep.subr.mxu1 %v444_v0 }
  0x40   :  { %335 = vmatpush3.msra.mxu1 %v154_v22 }
  0x41   :  { %336 = vmatprep.subr.mxu1 %v444_v0 }
  0x42   :  { %337 = vmatpush3.msra.mxu1 %v153_v23 }
  0x43   :  { %338 = vmatprep.subr.mxu1 %v444_v0 }
  0x44   :  { %339 = vmatpush3.msra.mxu1 %v152_v24 }
  0x45   :  { %340 = vmatprep.subr.mxu1 %v444_v0 }
  0x46   :  { %341 = vmatpush3.msra.mxu1 %v151_v25 }
  0xf7   :  { %v146_v27 = vpop.f32.mrf.mxu0 }
  0xf8   :  { %v147_v28 = vadd.f32 %v262_v26, %v146_v27 }
  0xf9   :  { %v309_v29 = vpop.f32.mrf.mxu0 }
  0xfa   :  { %v150_v30 = vmax.f32 %v147_v28, 0.0 }
  0xfc   :  { %343 = vmatmul.mubr.f32.vlgmr.msra.gmra.mxu1 %v150_v30 }
 0x1bc   :  { %v240_v32 = vpop.f32.mrf.mxu1 }
 0x1bd   :  { %v241_v33 = vadd.f32 %v264_v31, %v240_v32 }
 0x1be   :  { %v344_v34 = vpop.f32.mrf.mxu1 }
 0x1bf   :  { %v244_v35 = vmax.f32 %v241_v33, 0.0 }
 0x1c1   :  { %245 = vst [vmem:[#allocation8] sm:$0xff] %v244_v35 }
 0x1c2   :  { %424 = shalt.err (!%p421_p5)
}
 0x1c3   :  { %255 = dma.vmem_to_hbm [thread:$0]  %s253_s12, 128, %s526_s5, [#allocation4]  }
 0x1c4   :  { %437 = dma.done.wait [#allocation4], 128  }
 0x1c5   :  { %438 = vsyncadd [#allocation4], 4294967168 }
 0x1c6   :  { %259 = vsyncpa [#allocation3], 1 }
 0x1c7   :  { %260 = vsyncpa [#allocation6], 1 }
 0x1c8   :  { %261 = vsyncpa [#allocation4], 1 }

</bundles_post_ra>
